<compile_context>
chip_gen: v6e
topology: v6e:2x2x1
jax: 0.10.0
libtpu: 0.0.40
codegen_flags: <defaults>
</compile_context>

<pallas_src>
import functools

import jax
import jax.numpy as jnp
from jax.experimental import pallas as pl
from jax.experimental.pallas import tpu as pltpu


# --------------------------------------------------------------------------- #
# Kernels
# --------------------------------------------------------------------------- #
def _attention_pool(z_ref, wp1t_ref, bp1_ref, wp2_ref):
    """Shared prefix: project(z) -> tanh -> score -> softmax(seq) -> (beta*z).sum(1)."""
    tb, s, f = z_ref.shape
    z = z_ref[...].astype(jnp.float32)                          # (tb, S, F)

    # project[0]: one (tb*S, F) x (F, F) MXU GEMM; the reshape is a free
    # sublane merge when S % 8 == 0 (otherwise Mosaic inserts a relayout copy).
    h = jnp.tanh(
        jnp.dot(z.reshape(tb * s, f), wp1t_ref[...],
                preferred_element_type=jnp.float32) + bp1_ref[...])   # (tb*S, F)

    # project[2] = Linear(F, 1, bias=False): N=1 matvec -> keep it on the
    # VPU/XLU (multiply + lane reduce) instead of a 1-lane MXU pass.
    w = jnp.sum(h.reshape(tb, s, f) * wp2_ref[...].reshape(1, 1, f),
                axis=-1)                                        # (tb, S)

    # softmax over the sequence axis (PyTorch dim=1), max-stabilised, f32.
    m = jnp.max(w, axis=-1, keepdims=True)
    e = jnp.exp(w - m)
    beta = e * pl.reciprocal(jnp.sum(e, axis=-1, keepdims=True), approx=False)

    # seq = (beta * z).sum(1): VPU multiply + sublane reduce (no MXU).
    seq = jnp.sum(beta[:, :, None] * z, axis=1)                 # (tb, F)
    return seq


def _logreg_kernel_fused(z_ref, wp1t_ref, bp1_ref, wp2_ref, wc_ref, bc_ref,
                         out_ref):
    seq = _attention_pool(z_ref, wp1t_ref, bp1_ref, wp2_ref)
    out = jnp.dot(seq, wc_ref[...], preferred_element_type=jnp.float32) + bc_ref[...]
    out_ref[...] = out.astype(out_ref.dtype)


def _logreg_kernel_unfused(z_ref, wp1t_ref, bp1_ref, wp2_ref,
                           w1t_ref, b1_ref, w2t_ref, b2_ref, out_ref):
    seq = _attention_pool(z_ref, wp1t_ref, bp1_ref, wp2_ref)
    r1 = jnp.dot(seq, w1t_ref[...], preferred_element_type=jnp.float32) + b1_ref[...]
    out = jnp.dot(r1, w2t_ref[...], preferred_element_type=jnp.float32) + b2_ref[...]
    out_ref[...] = out.astype(out_ref.dtype)


# --------------------------------------------------------------------------- #
# Wrapper
# --------------------------------------------------------------------------- #
def _vmem_capacity_bytes():
    """Physical VMEM per TensorCore (128 MiB v5e/v6e, 64 MiB v7x); safe fallback."""
    try:
        info = pltpu.get_tpu_info()
        cap = getattr(info, "vmem_capacity_bytes", None)
        if cap:
            return int(cap)
    except Exception:
        pass
    return 64 * 1024 * 1024   # conservative (v7x per-core VMEM)


def _prepare_weights(params, fuse):
    """One-time weight prep (PyTorch layout -> (in, out); optional exact fc fusion)."""
    f32 = jnp.float32
    hi = jax.lax.Precision.HIGHEST          # one-time prep: keep it exact
    wp1t = jnp.asarray(params["proj0_w"], f32).T            # (F, F)
    bp1 = jnp.asarray(params["proj0_b"], f32).reshape(1, -1)
    wp2 = jnp.asarray(params["proj2_w"], f32).reshape(1, -1)
    prep = dict(wp1t=wp1t, bp1=bp1, wp2=wp2)
    if fuse:
        # Exact: there is no nonlinearity between fc1 and fc2.
        w1t = jnp.asarray(params["fc1_w"], f32).T            # (F, C)
        w2t = jnp.asarray(params["fc2_w"], f32).T            # (C, F)
        prep["wc"] = jnp.matmul(w1t, w2t, precision=hi)      # (F, F)
        prep["bc"] = (jnp.matmul(jnp.asarray(params["fc1_b"], f32), w2t,
                                 precision=hi)
                      + jnp.asarray(params["fc2_b"], f32)).reshape(1, -1)
    else:
        prep["w1t"] = jnp.asarray(params["fc1_w"], f32).T    # (F, C)
        prep["b1"] = jnp.asarray(params["fc1_b"], f32).reshape(1, -1)
        prep["w2t"] = jnp.asarray(params["fc2_w"], f32).T    # (C, F)
        prep["b2"] = jnp.asarray(params["fc2_b"], f32).reshape(1, -1)
    return prep


def _logreg_forward(z, prep, *, fuse, max_batch_tile=None):
    """z: (B, S, F) f32 or bf16. Returns (B, F) in z.dtype."""
    B, S, F = z.shape
    itemsize = jnp.dtype(z.dtype).itemsize

    # ---- generation-aware VMEM budget -------------------------------------
    vmem_cap = _vmem_capacity_bytes()
    vmem_limit = (vmem_cap * 3) // 4                  # 96 MiB v5e/v6e, 48 MiB v7x
    small_vmem = vmem_cap <= 80 * 1024 * 1024         # v7x-like (2 TCs, 64 MiB each)

    # ---- batch-tile sizing --------------------------------------------------
    # Live VMEM per batch row: double-buffered z tile (input dtype) plus ~3 f32
    # tile-sized temporaries in the kernel (f32 upcast, h, beta*z product).
    per_row = S * F * (2 * itemsize + 3 * 4)
    if fuse:
        w_elems = F * F + F * F + 3 * F
    else:
        C = prep["w1t"].shape[1]
        w_elems = F * F + 2 * F * C + 2 * F + C + F
    w_bytes = 2 * 4 * w_elems                          # weights are double-buffered
    # NOTE: the constant weight blocks could be single-buffered (pl.Buffered(1))
    # to free VMEM; default buffering is kept for portability and is accounted
    # for (2x) in w_bytes above.
    budget = (vmem_limit * 4) // 5 - w_bytes           # 20% headroom for Mosaic temps
    tb = max(8, budget // max(per_row, 1))
    if max_batch_tile is not None:
        tb = min(tb, max_batch_tile)
    tb = min(tb, B)
    if B > 8:
        # Keep a few grid steps for DMA/compute overlap; on dual-TensorCore
        # parts (v7x) keep >= 2 steps per core so "parallel" can shard the grid.
        min_steps = 4 if small_vmem else 2
        cap = max(8, ((B + min_steps - 1) // min_steps + 7) // 8 * 8)
        tb = min(tb, cap)
    if tb < B:
        tb = max(8, (tb // 8) * 8)     # partial batch tiles need sublane-aligned tb
    grid = (pl.cdiv(B, tb),)           # ragged last tile: reads padded, writes masked
    # TODO(synk): add an S grid axis with an online-softmax accumulator for very
    # long sequences (currently z + h for one batch tile must fit in VMEM).

    # ---- BlockSpecs (no padded copies of z: full-extent last dims are legal) -
    z_spec = pl.BlockSpec((tb, S, F), lambda b: (b, 0, 0))
    const = lambda b: (0, 0)
    out_spec = pl.BlockSpec((tb, F), lambda b: (b, 0))

    if fuse:
        kernel = _logreg_kernel_fused
        operands = (z, prep["wp1t"], prep["bp1"], prep["wp2"],
                    prep["wc"], prep["bc"])
    else:
        kernel = _logreg_kernel_unfused
        operands = (z, prep["wp1t"], prep["bp1"], prep["wp2"],
                    prep["w1t"], prep["b1"], prep["w2t"], prep["b2"])
    in_specs = [z_spec] + [pl.BlockSpec(op.shape, const) for op in operands[1:]]

    return pl.pallas_call(
        kernel,
        out_shape=jax.ShapeDtypeStruct((B, F), z.dtype),
        grid=grid,
        in_specs=in_specs,
        out_specs=out_spec,
        compiler_params=pltpu.CompilerParams(
            dimension_semantics=("parallel",),   # shard batch grid on v7x 2xTC
            vmem_limit_bytes=int(vmem_limit),
        ),
    )(*operands)


def make_logreg_forward(params, *, fuse=None, max_batch_tile=None):
    """Prep weights once and return a jitted forward: z -> (B, F)."""
    F = int(params["proj0_w"].shape[0])
    C = int(params["fc1_w"].shape[0])
    if fuse is None:
        # Fuse fc1∘fc2 only when the O(F^2) fused weight is cheap; at large F
        # keep the two O(F*C) GEMMs (less VMEM, fewer FLOPs when C << F).
        fuse = (F <= 256) or (2 * C >= F)
    prep = _prepare_weights(params, fuse)
    jitted = jax.jit(functools.partial(_logreg_forward, fuse=fuse,
                                       max_batch_tile=max_batch_tile))

    def forward(z):
        return jitted(z, prep)

    return forward


# --------------------------------------------------------------------------- #
# Reference + init (mirrors the PyTorch module)
# --------------------------------------------------------------------------- #
def _xavier_uniform(key, out_f, in_f, dtype=jnp.float32):
    limit = (6.0 / (in_f + out_f)) ** 0.5
    return jax.random.uniform(key, (out_f, in_f), dtype, -limit, limit)


def init_params(key, ft_in, nb_classes):
    k1, k2, k3, k4 = jax.random.split(key, 4)
    return {
        "fc1_w": _xavier_uniform(k1, nb_classes, ft_in),
        "fc1_b": jnp.zeros((nb_classes,), jnp.float32),
        "fc2_w": _xavier_uniform(k2, ft_in, nb_classes),
        "fc2_b": jnp.zeros((ft_in,), jnp.float32),
        "proj0_w": _xavier_uniform(k3, ft_in, ft_in),
        "proj0_b": jnp.zeros((ft_in,), jnp.float32),
        "proj2_w": _xavier_uniform(k4, 1, ft_in),   # Linear(ft_in, 1, bias=False)
    }


def logreg_ref(z, params):
    """Pure-JAX reference (mirrors the PyTorch forward exactly)."""
    h = jnp.tanh(jnp.einsum("bsf,gf->bsg", z, params["proj0_w"]) + params["proj0_b"])
    w = jnp.einsum("bsf,of->bso", h, params["proj2_w"])          # (B, S, 1)
    beta = jax.nn.softmax(w, axis=1)
    seq = jnp.sum(beta * z, axis=1)                              # (B, F)
    r1 = seq @ params["fc1_w"].T + params["fc1_b"]
    r2 = r1 @ params["fc2_w"].T + params["fc2_b"]
    return r2


if __name__ == "__main__":
    key = jax.random.PRNGKey(0)
    kz1, kp1, kz2, kp2 = jax.random.split(key, 4)

    # --- Test 1: tiny config, fused fc path, single grid step ----------------
    B, S, F, C = 2, 8, 32, 4   # batch, seq, ft_in, nb_classes
    z = jax.random.normal(kz1, (B, S, F), jnp.float32)
    params = init_params(kp1, F, C)
    fwd = make_logreg_forward(params)
    out = jax.block_until_ready(fwd(z))
    ref = logreg_ref(z, params)
    assert out.shape == (B, F)
    assert jnp.allclose(out, ref, atol=1e-4, rtol=1e-4), \
        f"fused path max err {jnp.max(jnp.abs(out - ref))}"

    # --- Test 2: unfused fc path + multi-step batch grid (forced 8-row tiles) -
    B2 = 24
    z2 = jax.random.normal(kz2, (B2, S, F), jnp.float32)
    params2 = init_params(kp2, F, C)
    fwd2 = make_logreg_forward(params2, fuse=False, max_batch_tile=8)
    out2 = jax.block_until_ready(fwd2(z2))
    ref2 = logreg_ref(z2, params2)
    assert out2.shape == (B2, F)
    assert jnp.allclose(out2, ref2, atol=1e-4, rtol=1e-4), \
        f"unfused path max err {jnp.max(jnp.abs(out2 - ref2))}"

    print("KERNEL_OK")
</pallas_src>

<mosaic_0001>
module attributes {stable_mosaic.version = 11 : i64} {
  func.func @_logreg_kernel_fused(%arg0: i32, %arg1: memref<2x8x32xf32, #tpu.memory_space<vmem>>, %arg2: memref<32x32xf32, #tpu.memory_space<vmem>>, %arg3: memref<1x32xf32, #tpu.memory_space<vmem>>, %arg4: memref<1x32xf32, #tpu.memory_space<vmem>>, %arg5: memref<32x32xf32, #tpu.memory_space<vmem>>, %arg6: memref<1x32xf32, #tpu.memory_space<vmem>>, %arg7: memref<2x32xf32, #tpu.memory_space<vmem>>) attributes {dimension_semantics = [#tpu.dimension_semantics<parallel>], iteration_bounds = array<i64: 1>, scalar_prefetch = 0 : i64, scratch_operands = 0 : i64, tpu.core_type = #tpu.core_type<tc>, window_params = [{transform_indices = @transform_0, window_bounds = array<i64: 2, 8, 32>}, {pipeline_mode = #tpu.pipeline_mode<synchronous>, transform_indices = @transform_1, window_bounds = array<i64: 32, 32>}, {pipeline_mode = #tpu.pipeline_mode<synchronous>, transform_indices = @transform_2, window_bounds = array<i64: 1, 32>}, {pipeline_mode = #tpu.pipeline_mode<synchronous>, transform_indices = @transform_3, window_bounds = array<i64: 1, 32>}, {pipeline_mode = #tpu.pipeline_mode<synchronous>, transform_indices = @transform_4, window_bounds = array<i64: 32, 32>}, {pipeline_mode = #tpu.pipeline_mode<synchronous>, transform_indices = @transform_5, window_bounds = array<i64: 1, 32>}, {transform_indices = @transform_6, window_bounds = array<i64: 2, 32>}]} {
    %c0 = arith.constant 0 : index
    %c0_0 = arith.constant 0 : index
    %c0_1 = arith.constant 0 : index
    %0 = vector.load %arg1[%c0, %c0_0, %c0_1] : memref<2x8x32xf32, #tpu.memory_space<vmem>>, vector<2x8x32xf32>
    %1 = vector.shape_cast %0 : vector<2x8x32xf32> to vector<16x32xf32>
    %c0_2 = arith.constant 0 : index
    %c0_3 = arith.constant 0 : index
    %2 = vector.load %arg2[%c0_2, %c0_3] : memref<32x32xf32, #tpu.memory_space<vmem>>, vector<32x32xf32>
    %cst = arith.constant dense<0.000000e+00> : vector<16x32xf32>
    %3 = tpu.matmul %1, %2, %cst {dimension_numbers = #tpu.dot_dimension_numbers<[1], [0], [0], [1], [0, 0, 1, 1], [], []>} : vector<16x32xf32>, vector<32x32xf32>, vector<16x32xf32> -> vector<16x32xf32>
    %c0_4 = arith.constant 0 : index
    %c0_5 = arith.constant 0 : index
    %4 = vector.load %arg3[%c0_4, %c0_5] : memref<1x32xf32, #tpu.memory_space<vmem>>, vector<1x32xf32>
    %5 = vector.broadcast %4 : vector<1x32xf32> to vector<16x32xf32>
    %6 = arith.addf %3, %5 : vector<16x32xf32>
    %7 = math.tanh %6 : vector<16x32xf32>
    %8 = vector.shape_cast %7 : vector<16x32xf32> to vector<2x8x32xf32>
    %c0_6 = arith.constant 0 : index
    %c0_7 = arith.constant 0 : index
    %9 = vector.load %arg4[%c0_6, %c0_7] : memref<1x32xf32, #tpu.memory_space<vmem>>, vector<1x32xf32>
    %10 = vector.shape_cast %9 : vector<1x32xf32> to vector<1x1x32xf32>
    %11 = vector.broadcast %10 : vector<1x1x32xf32> to vector<2x8x32xf32>
    %12 = arith.mulf %8, %11 : vector<2x8x32xf32>
    %cst_8 = arith.constant dense<0.000000e+00> : vector<2x8xf32>
    %13 = vector.multi_reduction <add>, %12, %cst_8 [2] : vector<2x8x32xf32> to vector<2x8xf32>
    %cst_9 = arith.constant dense<0xFF800000> : vector<2xf32>
    %14 = vector.multi_reduction <maximumf>, %13, %cst_9 [1] : vector<2x8xf32> to vector<2xf32>
    %15 = vector.shape_cast %14 : vector<2xf32> to vector<2x1xf32>
    %16 = vector.broadcast %15 : vector<2x1xf32> to vector<2x8xf32>
    %17 = arith.subf %13, %16 : vector<2x8xf32>
    %18 = math.exp %17 : vector<2x8xf32>
    %cst_10 = arith.constant dense<0.000000e+00> : vector<2xf32>
    %19 = vector.multi_reduction <add>, %18, %cst_10 [1] : vector<2x8xf32> to vector<2xf32>
    %20 = vector.shape_cast %19 : vector<2xf32> to vector<2x1xf32>
    %21 = tpu.reciprocal %20 : vector<2x1xf32> -> vector<2x1xf32>
    %22 = vector.broadcast %21 : vector<2x1xf32> to vector<2x8xf32>
    %23 = arith.mulf %18, %22 : vector<2x8xf32>
    %24 = vector.shape_cast %23 : vector<2x8xf32> to vector<2x8x1xf32>
    %25 = vector.broadcast %24 : vector<2x8x1xf32> to vector<2x8x32xf32>
    %26 = arith.mulf %25, %0 : vector<2x8x32xf32>
    %cst_11 = arith.constant dense<0.000000e+00> : vector<2x32xf32>
    %27 = vector.multi_reduction <add>, %26, %cst_11 [1] : vector<2x8x32xf32> to vector<2x32xf32>
    %c0_12 = arith.constant 0 : index
    %c0_13 = arith.constant 0 : index
    %28 = vector.load %arg5[%c0_12, %c0_13] : memref<32x32xf32, #tpu.memory_space<vmem>>, vector<32x32xf32>
    %cst_14 = arith.constant dense<0.000000e+00> : vector<2x32xf32>
    %29 = tpu.matmul %27, %28, %cst_14 {dimension_numbers = #tpu.dot_dimension_numbers<[1], [0], [0], [1], [0, 0, 1, 1], [], []>} : vector<2x32xf32>, vector<32x32xf32>, vector<2x32xf32> -> vector<2x32xf32>
    %c0_15 = arith.constant 0 : index
    %c0_16 = arith.constant 0 : index
    %30 = vector.load %arg6[%c0_15, %c0_16] : memref<1x32xf32, #tpu.memory_space<vmem>>, vector<1x32xf32>
    %31 = vector.broadcast %30 : vector<1x32xf32> to vector<2x32xf32>
    %32 = arith.addf %29, %31 : vector<2x32xf32>
    %c0_17 = arith.constant 0 : index
    %c0_18 = arith.constant 0 : index
    %33 = vector.load %arg7[%c0_17, %c0_18] : memref<2x32xf32, #tpu.memory_space<vmem>>, vector<2x32xf32>
    tpu.vector_store %arg7[%c0_17, %c0_18], %32 {strides = array<i32>} : memref<2x32xf32, #tpu.memory_space<vmem>>, vector<2x32xf32>,
    return
  }
  func.func @transform_0(%arg0: i32) -> (i32, i32, i32) {
    %c0_i32 = arith.constant 0 : i32
    %c0_i32_0 = arith.constant 0 : i32
    %c0_i32_1 = arith.constant 0 : i32
    return %arg0, %c0_i32, %c0_i32_0 : i32, i32, i32
  }
  func.func @transform_1(%arg0: i32) -> (i32, i32) {
    %c0_i32 = arith.constant 0 : i32
    %c0_i32_0 = arith.constant 0 : i32
    %c0_i32_1 = arith.constant 0 : i32
    return %c0_i32, %c0_i32_0 : i32, i32
  }
  func.func @transform_2(%arg0: i32) -> (i32, i32) {
    %c0_i32 = arith.constant 0 : i32
    %c0_i32_0 = arith.constant 0 : i32
    %c0_i32_1 = arith.constant 0 : i32
    return %c0_i32, %c0_i32_0 : i32, i32
  }
  func.func @transform_3(%arg0: i32) -> (i32, i32) {
    %c0_i32 = arith.constant 0 : i32
    %c0_i32_0 = arith.constant 0 : i32
    %c0_i32_1 = arith.constant 0 : i32
    return %c0_i32, %c0_i32_0 : i32, i32
  }
  func.func @transform_4(%arg0: i32) -> (i32, i32) {
    %c0_i32 = arith.constant 0 : i32
    %c0_i32_0 = arith.constant 0 : i32
    %c0_i32_1 = arith.constant 0 : i32
    return %c0_i32, %c0_i32_0 : i32, i32
  }
  func.func @transform_5(%arg0: i32) -> (i32, i32) {
    %c0_i32 = arith.constant 0 : i32
    %c0_i32_0 = arith.constant 0 : i32
    %c0_i32_1 = arith.constant 0 : i32
    return %c0_i32, %c0_i32_0 : i32, i32
  }
  func.func @transform_6(%arg0: i32) -> (i32, i32) {
    %c0_i32 = arith.constant 0 : i32
    %c0_i32_0 = arith.constant 0 : i32
    return %arg0, %c0_i32 : i32, i32
  }
}

</mosaic_0001>

<bundles_post_ra>
// kernel: _logreg_forward.1
= control target key start
LH: loop header
LB: loop body
LE: loop exit
PB: predicated region body
PF: predicated region fallthrough
CT: control target
= control target key end

     0   :  { %11 = vsyncpa [#allocation3], 0  ;;  %s646_s0 = inlined_call_operand.hbm [shape: f32[2,8,32], index: 0, kind: input, shape index: {}]   ;;  %s647_s1 = inlined_call_operand.hbm [shape: f32[32,32], index: 1, kind: input, shape index: {}]   ;;  %s648_s2 = inlined_call_operand.vmem [shape: f32[1,32], index: 2, kind: input, shape index: {}]   ;;  %s649_s3 = inlined_call_operand.vmem [shape: f32[1,32], index: 3, kind: input, shape index: {}]   ;;  %s650_s4 = inlined_call_operand.hbm [shape: f32[32,32], index: 4, kind: input, shape index: {}]   ;;  %s651_s5 = inlined_call_operand.hbm [shape: f32[1,32], index: 5, kind: input, shape index: {}]   ;;  %s652_s6 = inlined_call_operand.hbm [shape: f32[2,32], index: 6, kind: output, shape index: {}]  }
   0x1   :  { %12 = vsyncpa [#allocation6], 0 }
   0x2   :  { %13 = vsyncpa [#allocation9], 0 }
   0x3   :  { %14 = vsyncpa [#allocation4], 0  ;;  %s560_s21 = smov [#allocation5]   ;;  %s561_s23 = smov [#allocation2]  }
   0x4   :  { %s32_s22 = sshll.u32 %s560_s21, 4  ;;  %s20_s24 = sshll.u32 %s561_s23, 4  ;;  %s33_s22 = int_to_ptr.vmem [resolvable:$true] %s32_s22  ;;  %s21_s24 = int_to_ptr.vmem [resolvable:$true] %s20_s24 }
   0x5   :  { %s460_s25 = scalar_lea.vmem %s33_s22, 512  ;;  %p465_p1 = scmp.lt.s32.totalorder %s33_s22, %s33_s22 }
   0x6   :  { %p461_p0 = scmp.ne.s32.totalorder %s33_s22, %s460_s25  ;;  %p466_p2 = scmp.lt.s32.totalorder %s460_s25, %s460_s25 }
   0x8   :  { %p467_p3 = por %p466_p2, %p465_p1 }
   0xa   :  { %p468_p4 = pnand %p467_p3, %p461_p0 }
   0xc   :  { %471 = shalt.err (!%p468_p4)
}
   0xd   :  { %s562_s26 = smov 128   ;;  %s563_s27 = smov 8  }
   0xe   :  { %38 = dma.hbm_to_vmem [thread:$0]  %s647_s1, 512, %s33_s22, [#allocation6], %s562_s26, %s562_s26, %s563_s27  }
   0xf   :  { %s480_s30 = scalar_lea.vmem %s21_s24, 256  ;;  %p485_p6 = scmp.lt.s32.totalorder %s21_s24, %s21_s24 }
  0x10   :  { %p481_p5 = scmp.ne.s32.totalorder %s21_s24, %s480_s30  ;;  %p486_p7 = scmp.lt.s32.totalorder %s480_s30, %s480_s30 }
  0x12   :  { %p487_p8 = por %p486_p7, %p485_p6 }
  0x14   :  { %p488_p9 = pnand %p487_p8, %p481_p5 }
  0x16   :  { %491 = shalt.err (!%p488_p9)
}
  0x17   :  { %26 = dma.hbm_to_vmem [thread:$0]  %s646_s0, 256, %s21_s24, [#allocation3], %s562_s26, %s562_s26, %s563_s27  }
  0x18   :  { %s564_s9 = smov [#allocation7]   ;;  %s565_s11 = smov [#allocation8]  }
  0x19   :  { %s48_s10 = sshll.u32 %s564_s9, 4  ;;  %s61_s12 = sshll.u32 %s565_s11, 4  ;;  %s49_s10 = int_to_ptr.vmem [resolvable:$true] %s48_s10  ;;  %s62_s12 = int_to_ptr.vmem [resolvable:$true] %s61_s12 }
  0x1a   :  { %s500_s13 = scalar_lea.vmem %s49_s10, 512  ;;  %p505_p11 = scmp.lt.s32.totalorder %s49_s10, %s49_s10 }
  0x1b   :  { %p501_p10 = scmp.ne.s32.totalorder %s49_s10, %s500_s13  ;;  %p506_p12 = scmp.lt.s32.totalorder %s500_s13, %s500_s13 }
  0x1d   :  { %p507_p13 = por %p506_p12, %p505_p11 }
  0x1f   :  { %p508_p0 = pnand %p507_p13, %p501_p10 }
  0x21   :  { %511 = shalt.err (!%p508_p0)
}
  0x22   :  { %54 = dma.hbm_to_vmem [thread:$0]  %s650_s4, 512, %s49_s10, [#allocation6], %s562_s26, %s562_s26, %s563_s27  }
  0x23   :  { %s520_s15 = scalar_lea.vmem %s62_s12, 16  ;;  %s524_s0 = scalar_lea.vmem %s62_s12, 32 }
  0x24   :  { %p521_p1 = scmp.ne.s32.totalorder %s62_s12, %s520_s15  ;;  %p525_p2 = scmp.lt.s32.totalorder %s62_s12, %s62_s12 }
  0x25   :  { %p526_p3 = scmp.lt.s32.totalorder %s524_s0, %s520_s15 }
  0x27   :  { %p527_p4 = por %p526_p3, %p525_p2 }
  0x29   :  { %p528_p5 = pnand %p527_p4, %p521_p1 }
  0x2b   :  { %531 = shalt.err (!%p528_p5)
}
  0x2c   :  { %64 = dma.hbm_to_vmem [thread:$0]  %s651_s5, 16, %s62_s12, [#allocation9]  }
  0x2d   :  { %552 = dma.done.wait [#allocation3], 256  }
  0x2e   :  { %553 = vsyncadd [#allocation3], 4294967040 }
  0x2f   :  { %554 = dma.done.wait [#allocation6], 1024  }
  0x30   :  { %555 = vsyncadd [#allocation6], 4294966272 }
  0x31   :  { %556 = dma.done.wait [#allocation9], 16  }
  0x32   :  { %557 = vsyncadd [#allocation9], 4294967280  ;;  %vm90_vm0 = vcmask 261120   ;;  %v82_v0 = vld [vmem:[#allocation5 + $0x18] sm:$0xff]  ;;  %v81_v1 = vld [vmem:[#allocation5 + $0x10] sm:$0xff]  ;;  %v191_v18 = vlaneseq  ;;  %vm201_vm1 = vcmask 1041409  }
  0x33   :  { %408 = vmatprep.subr.mxu0 %v82_v0  ;;  %v617_v2 = vld [vmem:[#allocation2] sm:$0xff]  ;;  %v80_v3 = vld [vmem:[#allocation5 + $0x8] sm:$0xff]  ;;  %v79_v4 = vld [vmem:[#allocation5] sm:$0xff]  ;;  %vm204_vm2 = vcmask 58368   ;;  %v566_v28 = vmov 0   ;;  %v567_v52 = vmov 0.0  }
  0x34   :  { %409 = vmatpush3.msra.mxu0 %v82_v0  ;;  %416 = vmatprep.mubr.msk.f32.mxu0 %vm90_vm0, %v617_v2  ;;  %v621_v5 = vld [vmem:[#allocation2 + $0x8] sm:$0xff]  ;;  %v391_v6 = vld [vmem:[%s648_s2] ss:$0 sm:$0xff]  ;;  %v192_v19 = vand.u32 127, %v191_v18  ;;  %v194_v20 = vshrl.u32 %v191_v18, 7  ;;  %v287_v55 = vld [vmem:[#allocation7 + $0x8] sm:$0xff] }
  0x35   :  { %410 = vmatprep.subr.mxu0 %v81_v1  ;;  %v394_v13 = vld [vmem:[%s649_s3] ss:$0 sm:$0xff]  ;;  %441 = vset.pattern.permute.xlu0 %v566_v28  ;;  %v289_v53 = vld [vmem:[#allocation7 + $0x18] sm:$0xff]  ;;  %v286_v56 = vld [vmem:[#allocation7] sm:$0xff]  ;;  %vm568_vm3 = vmmov 0   ;;  %s569_s2 = smov [#allocation10]  }
  0x36   :  { %411 = vmatpush3.msra.mxu0 %v81_v1  ;;  %v195_v22 = vsub.s32 %v192_v19, %v194_v20  ;;  %440 = vset.pattern.permute.xlu1 %v566_v28  ;;  %v211_v29 = vsub.s32 0, %v194_v20  ;;  %v215_v30 = vsub.s32 1, %v194_v20  ;;  %v288_v54 = vld [vmem:[#allocation7 + $0x10] sm:$0xff]  ;;  %s380_s3 = sshll.u32 %s569_s2, 4  ;;  %vm372_vm4 = vcmask 254976   ;;  %s381_s3 = int_to_ptr.vmem [resolvable:$true] %s380_s3 }
  0x37   :  { %412 = vmatprep.subr.mxu0 %v80_v3  ;;  %419 = vmatprep.subr.mxu1 %v567_v52  ;;  %s532_s20 = scalar_lea.vmem %s381_s3, 32  ;;  %p537_p7 = scmp.lt.s32.totalorder %s381_s3, %s381_s3 }
  0x38   :  { %413 = vmatpush3.msra.mxu0 %v80_v3  ;;  %420 = vmatpush3.msra.mxu1 %v289_v53  ;;  %p533_p6 = scmp.ne.s32.totalorder %s381_s3, %s532_s20  ;;  %p538_p8 = scmp.lt.s32.totalorder %s532_s20, %s532_s20 }
  0x39   :  { %414 = vmatprep.subr.mxu0 %v79_v4  ;;  %421 = vmatprep.subr.mxu1 %v567_v52 }
  0x3a   :  { %415 = vmatpush3.msra.mxu0 %v79_v4  ;;  %422 = vmatpush3.msra.mxu1 %v288_v54  ;;  %p539_p9 = por %p538_p8, %p537_p7 }
  0x3b   :  { %417 = vmatmul.mubr.msk.f32.vlgmr.msra.gmra.mxu0 %vm90_vm0, %v621_v5  ;;  %423 = vmatprep.subr.mxu1 %v567_v52 }
  0x3c   :  { %424 = vmatpush3.msra.mxu1 %v287_v55  ;;  %427 = vmatprep.mubr.msk.f32.mxu1 %vm568_vm3, %v567_v52  ;;  %p540_p10 = pnand %p539_p9, %p533_p6 }
  0x3d   :  { %425 = vmatprep.subr.mxu1 %v567_v52 }
  0x3e   :  { %426 = vmatpush3.msra.mxu1 %v286_v56 }
  0xfb   :  { %v418_v7 = vpop.f32.mrf.mxu0 }
  0xfc   :  { %v169_v8 = vadd.f32 %v418_v7, %v391_v6 }
  0xfd   :  { %v163_v9 = vpop.f32.mrf.mxu0 }
  0xfe   :  { %v164_v10 = vadd.f32 %v391_v6, %v163_v9  ;;  %442 = vtanh.f32 %v169_v8 }
 0x100   :  { %444 = vtanh.f32 %v164_v10 }
 0x10b   :  { %v443_v11 = vpop.eup %442 }
 0x10c   :  { %v182_v16 = vmul.f32 %v443_v11, %v394_v13 }
 0x10d   :  { %v445_v12 = vpop.eup %444 }
 0x10e   :  { %v181_v14 = vmul.f32 %v445_v12, %v394_v13  ;;  %v186_v17 = vsel %vm90_vm0, %v182_v16, 0.0  ;;  %v395_v13 = vld [vmem:[#allocation8] ss:$0 sm:$0xff] }
 0x110   :  { %v183_v15 = vsel %vm90_vm0, %v181_v14, 0.0 }
 0x111   :  { %184 = vadd.xlane.f32.xlu0 %v183_v15 }
 0x115   :  { %187 = vadd.xlane.f32.xlu0 %v186_v17 }
 0x19a   :  { %v185_v21 = vpop.xlane.xlu0 %184 }
 0x19b   :  { %v196_v24 = vrot.slane %v185_v21, %v195_v22 }
 0x19e   :  { %v188_v23 = vpop.xlane.xlu0 %187 }
 0x19f   :  { %v200_v25 = vrot.slane %v188_v23, %v195_v22 }
 0x1a1   :  { %v202_v26 = vsel %vm201_vm1, %v200_v25, %v196_v24 }
 0x1a2   :  { %v205_v27 = vsel %vm204_vm2, %v202_v26, -inf }
 0x1a3   :  { %206 = vmax.xlane.f32.xlu1 %v205_v27 }
 0x22c   :  { %v207_v31 = vpop.xlane.xlu1 %206 }
 0x22d   :  { %v212_v32 = vrot.slane %v207_v31, %v211_v29  ;;  %v216_v33 = vrot.slane %v207_v31, %v215_v30 }
 0x22f   :  { %v219_v34 = vsub.f32 %v185_v21, %v212_v32  ;;  %v220_v35 = vsub.f32 %v188_v23, %v216_v33 }
 0x231   :  { %v221_v36 = vmul.f32 1.442695, %v219_v34  ;;  %v223_v37 = vmul.f32 1.442695, %v220_v35 }
 0x233   :  { %446 = vpow2.f32 %v221_v36 }
 0x234   :  { %448 = vpow2.f32 %v223_v37 }
 0x240   :  { %v447_v38 = vpop.eup %446 }
 0x241   :  { %v449_v39 = vpop.eup %448  ;;  %228 = vperm.xlu1 %440, %v447_v38  }
 0x242   :  { %231 = vperm.xlu0 %441, %v449_v39  }
 0x2bc   :  { %v229_v40 = vpop.permute.xlu1 %228 }
 0x2bd   :  { %v232_v41 = vpop.permute.xlu0 %231  ;;  %v236_v42 = vrot.slane %v229_v40, %v195_v22 }
 0x2be   :  { %v240_v43 = vrot.slane %v232_v41, %v195_v22 }
 0x2c0   :  { %v241_v44 = vsel %vm201_vm1, %v240_v43, %v236_v42 }
 0x2c1   :  { %v243_v45 = vsel %vm204_vm2, %v241_v44, 0.0 }
 0x2c2   :  { %244 = vadd.xlane.f32.xlu1 %v243_v45 }
 0x34b   :  { %v245_v46 = vpop.xlane.xlu1 %244 }
 0x34c   :  { %450 = vrcp.f32 %v245_v46 }
 0x359   :  { %v451_v47 = vpop.eup %450 }
 0x35a   :  { %v251_v48 = vrot.slane %v451_v47, %v211_v29  ;;  %v255_v50 = vrot.slane %v451_v47, %v215_v30 }
 0x35c   :  { %v258_v49 = vmul.f32 %v447_v38, %v251_v48  ;;  %v259_v51 = vmul.f32 %v449_v39, %v255_v50 }
 0x35e   :  { %262 = vperm.xlu0 %441, %v258_v49  }
 0x362   :  { %267 = vperm.xlu0 %441, %v259_v51  }
 0x3d9   :  { %v263_v57 = vpop.permute.xlu0 %262 }
 0x3da   :  { %v270_v58 = vmul.f32 %v263_v57, %v617_v2 }
 0x3dc   :  { %v272_v59 = vsel %vm90_vm0, %v270_v58, 0.0 }
 0x3dd   :  { %v273_v60 = vrot.slane %v272_v59, 4  ;;  %v268_v61 = vpop.permute.xlu0 %267 }
 0x3de   :  { %v271_v62 = vmul.f32 %v268_v61, %v621_v5 }
 0x3df   :  { %v274_v63 = vadd.f32 %v273_v60, %v272_v59 }
 0x3e0   :  { %v279_v0 = vsel %vm90_vm0, %v271_v62, 0.0 }
 0x3e1   :  { %v275_v1 = vrot.slane %v274_v63, 2  ;;  %v280_v3 = vrot.slane %v279_v0, 4 }
 0x3e3   :  { %v276_v4 = vadd.f32 %v275_v1, %v274_v63  ;;  %v281_v6 = vadd.f32 %v280_v3, %v279_v0 }
 0x3e5   :  { %v282_v7 = vrot.slane %v281_v6, 2  ;;  %v277_v8 = vrot.slane %v276_v4, 1 }
 0x3e7   :  { %v283_v9 = vadd.f32 %v282_v7, %v281_v6  ;;  %v278_v11 = vadd.f32 %v277_v8, %v276_v4 }
 0x3e9   :  { %v284_v10 = vrot.slane %v283_v9, 1 }
 0x3eb   :  { %v285_v12 = vadd.f32 %v284_v10, %v283_v9 }
 0x3ed   :  { %v299_v2 = vsel %vm201_vm1, %v285_v12, %v278_v11 }
 0x3ee   :  { %428 = vmatmul.mubr.msk.f32.vlgmr.msra.gmra.mxu1 %vm90_vm0, %v299_v2 }
 0x4ae   :  { %v368_v5 = vpop.f32.mrf.mxu1 }
 0x4af   :  { %v369_v14 = vadd.f32 %v395_v13, %v368_v5 }
 0x4b0   :  { %v429_v15 = vpop.f32.mrf.mxu1 }
 0x4b1   :  { %373 = vst.msk [vmem:[#allocation10] sm:$0x3] %vm372_vm4, %v369_v14 }
 0x4b2   :  { %543 = shalt.err (!%p540_p10)
}
 0x4b3   :  { %383 = dma.vmem_to_hbm [thread:$0]  %s381_s3, 32, %s652_s6, [#allocation4]  }
 0x4b4   :  { %558 = dma.done.wait [#allocation4], 32  }
 0x4b5   :  { %559 = vsyncadd [#allocation4], 4294967264 }
 0x4b6   :  { %387 = vsyncpa [#allocation3], 1 }
 0x4b7   :  { %388 = vsyncpa [#allocation6], 1 }
 0x4b8   :  { %389 = vsyncpa [#allocation9], 1 }
 0x4b9   :  { %390 = vsyncpa [#allocation4], 1 }

</bundles_post_ra>
